<compile_context>
chip_gen: v7x
topology: tpu7x:2x2x1
jax: 0.10.0
libtpu: 0.0.40
codegen_flags: <defaults>
</compile_context>

<pallas_src>
import jax
import jax.numpy as jnp
from jax.experimental import pallas as pl
from jax.experimental.pallas import tpu as pltpu


def _mish_kernel(x_ref, o_ref):
    x = x_ref[...].astype(jnp.float32)
    # mish(x) = x * tanh(softplus(x)) = x * (1 - 2 / ((1 + e^x)^2 + 1))
    # Clamp the exp argument: for x >= 20 the correction term is < 1e-17, so
    # mish(x) == x to f32 precision, and the clamp avoids inf/NaN in the
    # Newton refinement below.
    e = jnp.exp(jnp.minimum(x, 20.0))
    t = 1.0 + e
    inner = t * t + 1.0
    # EUP approx reciprocal (cheap, separate slot) + one VPU Newton step
    # recovers ~full f32 precision; exp stays the only heavy transcendental.
    r = pl.reciprocal(inner, approx=True)
    r = r * (2.0 - inner * r)
    o_ref[...] = (x * (1.0 - 2.0 * r)).astype(o_ref.dtype)


def mish(x: jax.Array, *, lane_width: int = 1024,
         target_block_bytes: int = 4 * 1024 * 1024) -> jax.Array:
    """Elementwise Mish via Pallas. Accepts any shape / float dtype."""
    orig_shape = x.shape
    dtype = x.dtype
    n = x.size
    if n == 0:
        return x

    W = lane_width                               # multiple of 128 (lane dim)
    itemsize = jnp.dtype(dtype).itemsize
    sub = max(8, 32 // itemsize)                 # 8 f32, 16 bf16, 32 int8/fp8

    xf = x.reshape(-1)
    rem = n % W
    if rem:
        # Only pad when the flat length is not lane-width aligned.
        xf = jnp.pad(xf, (0, W - rem))
    rows = xf.size // W
    x2d = xf.reshape(rows, W)

    # Big row tile (~target_block_bytes per block), multiple of the packed
    # sublane tile, capped for small inputs. Partial last block handled by
    # Pallas via cdiv grid -- no divisibility requirement on `rows`.
    tr = max(sub, (target_block_bytes // (W * itemsize)) // sub * sub)
    rows_rounded = ((rows + sub - 1) // sub) * sub
    tr = min(tr, rows_rounded)

    grid = (pl.cdiv(rows, tr),)

    out2d = pl.pallas_call(
        _mish_kernel,
        out_shape=jax.ShapeDtypeStruct((rows, W), dtype),
        grid_spec=pltpu.PrefetchScalarGridSpec(
            num_scalar_prefetch=0,
            grid=grid,
            in_specs=[pl.BlockSpec((tr, W), lambda i: (i, 0))],
            out_specs=pl.BlockSpec((tr, W), lambda i: (i, 0)),
        ),
        compiler_params=pltpu.CompilerParams(
            # Single axis, independent blocks -> shard across TCs on v7x.
            dimension_semantics=("parallel",),
            # Cover 2x(in+out) double buffering of 4 MiB blocks on every
            # generation (raises v5e's 16 MiB scoped default, well under
            # v7x's 64 MiB physical VMEM).
            vmem_limit_bytes=48 * 1024 * 1024,
        ),
        cost_estimate=pl.CostEstimate(
            flops=8 * n,
            transcendentals=n,
            bytes_accessed=2 * n * itemsize,
        ),
    )(x2d)

    out = out2d.reshape(-1)
    if rem:
        out = out[:n]
    return out.reshape(orig_shape)


def _mish_ref(x):
    xf = x.astype(jnp.float32)
    sp = jnp.maximum(xf, 0.0) + jnp.log1p(jnp.exp(-jnp.abs(xf)))
    return (xf * jnp.tanh(sp)).astype(x.dtype)


if __name__ == "__main__":
    key = jax.random.PRNGKey(0)
    # NCHW input, consistent with typical conv-activation usage.
    x = jax.random.normal(key, (2, 4, 16, 16), dtype=jnp.float32) * 3.0

    y = mish(x)
    jax.block_until_ready(y)

    y_ref = _mish_ref(x)
    assert y.shape == x.shape and y.dtype == x.dtype
    # Tolerance accounts for the single-exp + Newton-refined reciprocal
    # formulation vs the log1p/tanh reference path (error << 1e-4).
    assert jnp.allclose(y, y_ref, atol=1e-4, rtol=1e-4), "mismatch vs reference"

    print("KERNEL_OK")
</pallas_src>

<mosaic_0001>
module attributes {stable_mosaic.version = 11 : i64} {
  func.func @_mish_kernel(%arg0: i32, %arg1: memref<8x1024xf32, #tpu.memory_space<vmem>>, %arg2: memref<8x1024xf32, #tpu.memory_space<vmem>>) attributes {dimension_semantics = [#tpu.dimension_semantics<parallel>], iteration_bounds = array<i64: 1>, scalar_prefetch = 0 : i64, scratch_operands = 0 : i64, tpu.core_type = #tpu.core_type<tc>, window_params = [{transform_indices = @transform_0, window_bounds = array<i64: 8, 1024>}, {transform_indices = @transform_1, window_bounds = array<i64: 8, 1024>}]} {
    %c0 = arith.constant 0 : index
    %c0_0 = arith.constant 0 : index
    %0 = vector.load %arg1[%c0, %c0_0] : memref<8x1024xf32, #tpu.memory_space<vmem>>, vector<8x1024xf32>
    %cst = arith.constant 2.000000e+01 : f32
    %1 = vector.broadcast %cst : f32 to vector<8x1024xf32>
    %2 = arith.minimumf %0, %1 : vector<8x1024xf32>
    %3 = math.exp %2 : vector<8x1024xf32>
    %cst_1 = arith.constant 1.000000e+00 : f32
    %4 = vector.broadcast %cst_1 : f32 to vector<8x1024xf32>
    %5 = arith.addf %4, %3 : vector<8x1024xf32>
    %6 = arith.mulf %5, %5 : vector<8x1024xf32>
    %cst_2 = arith.constant 1.000000e+00 : f32
    %7 = vector.broadcast %cst_2 : f32 to vector<8x1024xf32>
    %8 = arith.addf %6, %7 : vector<8x1024xf32>
    %9 = tpu.reciprocal %8 {approx = true} : vector<8x1024xf32> -> vector<8x1024xf32>
    %10 = arith.mulf %8, %9 : vector<8x1024xf32>
    %cst_3 = arith.constant 2.000000e+00 : f32
    %11 = vector.broadcast %cst_3 : f32 to vector<8x1024xf32>
    %12 = arith.subf %11, %10 : vector<8x1024xf32>
    %13 = arith.mulf %9, %12 : vector<8x1024xf32>
    %cst_4 = arith.constant 2.000000e+00 : f32
    %14 = vector.broadcast %cst_4 : f32 to vector<8x1024xf32>
    %15 = arith.mulf %14, %13 : vector<8x1024xf32>
    %cst_5 = arith.constant 1.000000e+00 : f32
    %16 = vector.broadcast %cst_5 : f32 to vector<8x1024xf32>
    %17 = arith.subf %16, %15 : vector<8x1024xf32>
    %18 = arith.mulf %0, %17 : vector<8x1024xf32>
    %c0_6 = arith.constant 0 : index
    %c0_7 = arith.constant 0 : index
    %19 = vector.load %arg2[%c0_6, %c0_7] : memref<8x1024xf32, #tpu.memory_space<vmem>>, vector<8x1024xf32>
    tpu.vector_store %arg2[%c0_6, %c0_7], %18 {strides = array<i32>} : memref<8x1024xf32, #tpu.memory_space<vmem>>, vector<8x1024xf32>,
    return
  }
  func.func @transform_0(%arg0: i32) -> (i32, i32) {
    %c0_i32 = arith.constant 0 : i32
    %c0_i32_0 = arith.constant 0 : i32
    return %arg0, %c0_i32 : i32, i32
  }
  func.func @transform_1(%arg0: i32) -> (i32, i32) {
    %c0_i32 = arith.constant 0 : i32
    %c0_i32_0 = arith.constant 0 : i32
    return %arg0, %c0_i32 : i32, i32
  }
}

</mosaic_0001>

<bundles_post_ra>
// kernel: tpu_custom_call.1
= control target key start
LH: loop header
LB: loop body
LE: loop exit
PB: predicated region body
PF: predicated region fallthrough
CT: control target
= control target key end

     0   :  { %6 = vsyncpa [#allocation3], 0  ;;  %s320_s0 = inlined_call_operand.hbm [shape: f32[2,1024], index: 0, kind: input, shape index: {}]   ;;  %s321_s1 = inlined_call_operand.hbm [shape: f32[2,1024], index: 1, kind: output, shape index: {}]  }
   0x1   :  { %7 = vsyncpa [#allocation4], 0 }
   0x2   :  { %12 = vsyncadd [#allocation3], 768  ;;  %s244_s6 = smov [#allocation2]   ;;  %s196_s10 = scalar_lea.hbm %s320_s0, 256 }
   0x3   :  { %s13_s7 = sshll.u32 %s244_s6, 4  ;;  %p197_p0 = scmp.ne.s32.totalorder %s320_s0, %s196_s10  ;;  %s14_s7 = int_to_ptr.vmem [resolvable:$true] %s13_s7 }
   0x4   :  { %p200_p1 = scmp.lt.u32.totalorder %s196_s10, %s320_s0 }
   0x6   :  { %p202_p2 = pnand %p200_p1, %p197_p0 }
   0x8   :  { %205 = shalt.err (!%p202_p2)
}
   0x9   :  { %s206_s15 = scalar_lea.vmem %s14_s7, 256  ;;  %s210_s16 = scalar_lea.vmem %s14_s7, 1024 }
   0xa   :  { %p207_p3 = scmp.ne.s32.totalorder %s14_s7, %s206_s15  ;;  %p211_p4 = scmp.lt.s32.totalorder %s14_s7, %s14_s7 }
   0xb   :  { %p212_p5 = scmp.lt.s32.totalorder %s210_s16, %s206_s15 }
   0xd   :  { %p213_p6 = por %p212_p5, %p211_p4 }
   0xf   :  { %p214_p7 = pnand %p213_p6, %p207_p3 }
  0x11   :  { %217 = shalt.err (!%p214_p7)
}
  0x12   :  { %s245_s17 = smov 256   ;;  %s246_s18 = smov 16  }
  0x13   :  { %19 = dma.hbm_to_vmem [thread:$0]  %s320_s0, 256, %s14_s7, [#allocation3], %s245_s17, %s245_s17, %s246_s18  }
  0x14   :  { %240 = dma.done.wait [#allocation3], 1024  }
  0x15   :  { %241 = vsyncadd [#allocation3], 4294966272  ;;  %v273_v0 = vld [vmem:[#allocation2] sm:$0xff]  ;;  %v275_v1 = vld [vmem:[#allocation2 + $0x8] sm:$0xff] }
  0x16   :  { %v277_v2 = vld [vmem:[#allocation2 + $0x10] sm:$0xff]  ;;  %v31_v3 = vmin.f32 %v273_v0, 20.0  ;;  %v32_v4 = vmin.f32 %v275_v1, 20.0  ;;  %v282_v6 = vld [vmem:[#allocation2 + $0x18] sm:$0xff]  ;;  %v284_v7 = vld [vmem:[#allocation2 + $0x20] sm:$0xff] }
  0x17   :  { %v33_v5 = vmin.f32 %v277_v2, 20.0  ;;  %v286_v8 = vld [vmem:[#allocation2 + $0x28] sm:$0xff]  ;;  %v34_v9 = vmin.f32 %v282_v6, 20.0  ;;  %v35_v10 = vmin.f32 %v284_v7, 20.0  ;;  %v291_v12 = vld [vmem:[#allocation2 + $0x30] sm:$0xff]  ;;  %v293_v13 = vld [vmem:[#allocation2 + $0x38] sm:$0xff] }
  0x18   :  { %v36_v11 = vmin.f32 %v286_v8, 20.0  ;;  %v39_v14 = vmul.f32 1.442695, %v31_v3  ;;  %v41_v15 = vmul.f32 1.442695, %v32_v4  ;;  %v37_v19 = vmin.f32 %v291_v12, 20.0 }
  0x19   :  { %v43_v16 = vmul.f32 1.442695, %v33_v5  ;;  %v45_v17 = vmul.f32 1.442695, %v34_v9  ;;  %v47_v18 = vmul.f32 1.442695, %v35_v10 }
  0x1a   :  { %164 = vpow2.f32 %v39_v14  ;;  %v38_v20 = vmin.f32 %v293_v13, 20.0  ;;  %v49_v21 = vmul.f32 1.442695, %v36_v11  ;;  %v51_v22 = vmul.f32 1.442695, %v37_v19 }
  0x1b   :  { %166 = vpow2.f32 %v41_v15 }
  0x1c   :  { %168 = vpow2.f32 %v43_v16  ;;  %v53_v23 = vmul.f32 1.442695, %v38_v20 }
  0x1d   :  { %170 = vpow2.f32 %v45_v17 }
  0x1e   :  { %172 = vpow2.f32 %v47_v18 }
  0x1f   :  { %174 = vpow2.f32 %v49_v21 }
  0x20   :  { %176 = vpow2.f32 %v51_v22 }
  0x21   :  { %178 = vpow2.f32 %v53_v23 }
  0x24   :  { %v165_v24 = vpop.eup %164 }
  0x25   :  { %v167_v25 = vpop.eup %166  ;;  %v55_v26 = vadd.f32 1.0, %v165_v24 }
  0x26   :  { %v169_v27 = vpop.eup %168  ;;  %v56_v28 = vadd.f32 1.0, %v167_v25 }
  0x27   :  { %v171_v29 = vpop.eup %170  ;;  %v63_v30 = vmul.f32 %v55_v26, %v55_v26  ;;  %v57_v31 = vadd.f32 1.0, %v169_v27 }
  0x28   :  { %v173_v32 = vpop.eup %172  ;;  %v64_v33 = vmul.f32 %v56_v28, %v56_v28  ;;  %v58_v34 = vadd.f32 1.0, %v171_v29 }
  0x29   :  { %v175_v35 = vpop.eup %174  ;;  %v71_v36 = vadd.f32 1.0, %v63_v30  ;;  %v65_v37 = vmul.f32 %v57_v31, %v57_v31  ;;  %v59_v38 = vadd.f32 1.0, %v173_v32 }
  0x2a   :  { %v177_v39 = vpop.eup %176  ;;  %v72_v40 = vadd.f32 1.0, %v64_v33  ;;  %v66_v41 = vmul.f32 %v58_v34, %v58_v34  ;;  %v60_v42 = vadd.f32 1.0, %v175_v35 }
  0x2b   :  { %v179_v43 = vpop.eup %178  ;;  %180 = vrcp.f32 %v71_v36  ;;  %v73_v44 = vadd.f32 1.0, %v65_v37  ;;  %v67_v45 = vmul.f32 %v59_v38, %v59_v38  ;;  %v61_v46 = vadd.f32 1.0, %v177_v39 }
  0x2c   :  { %182 = vrcp.f32 %v72_v40  ;;  %v74_v47 = vadd.f32 1.0, %v66_v41  ;;  %v68_v48 = vmul.f32 %v60_v42, %v60_v42  ;;  %v62_v49 = vadd.f32 1.0, %v179_v43 }
  0x2d   :  { %184 = vrcp.f32 %v73_v44  ;;  %v75_v50 = vadd.f32 1.0, %v67_v45  ;;  %v69_v51 = vmul.f32 %v61_v46, %v61_v46 }
  0x2e   :  { %186 = vrcp.f32 %v74_v47  ;;  %v76_v52 = vadd.f32 1.0, %v68_v48  ;;  %v70_v53 = vmul.f32 %v62_v49, %v62_v49 }
  0x2f   :  { %188 = vrcp.f32 %v75_v50  ;;  %v77_v54 = vadd.f32 1.0, %v69_v51 }
  0x30   :  { %190 = vrcp.f32 %v76_v52  ;;  %v78_v55 = vadd.f32 1.0, %v70_v53 }
  0x31   :  { %192 = vrcp.f32 %v77_v54 }
  0x32   :  { %194 = vrcp.f32 %v78_v55 }
  0x35   :  { %v181_v56 = vpop.eup %180 }
  0x36   :  { %v183_v57 = vpop.eup %182  ;;  %v87_v58 = vmul.f32 %v181_v56, %v71_v36 }
  0x37   :  { %v185_v59 = vpop.eup %184  ;;  %v88_v60 = vmul.f32 %v183_v57, %v72_v40 }
  0x38   :  { %v187_v61 = vpop.eup %186  ;;  %v95_v62 = vsub.f32 2.0, %v87_v58  ;;  %v89_v63 = vmul.f32 %v185_v59, %v73_v44 }
  0x39   :  { %v189_v3 = vpop.eup %188  ;;  %v96_v4 = vsub.f32 2.0, %v88_v60  ;;  %v90_v5 = vmul.f32 %v187_v61, %v74_v47 }
  0x3a   :  { %v191_v9 = vpop.eup %190  ;;  %v103_v10 = vmul.f32 %v181_v56, %v95_v62  ;;  %v97_v11 = vsub.f32 2.0, %v89_v63  ;;  %v91_v14 = vmul.f32 %v189_v3, %v75_v50 }
  0x3b   :  { %v193_v15 = vpop.eup %192  ;;  %v104_v16 = vmul.f32 %v183_v57, %v96_v4  ;;  %v98_v17 = vsub.f32 2.0, %v90_v5  ;;  %v92_v18 = vmul.f32 %v191_v9, %v76_v52 }
  0x3c   :  { %v195_v19 = vpop.eup %194  ;;  %v111_v20 = vmul.f32 2.0, %v103_v10  ;;  %v105_v21 = vmul.f32 %v185_v59, %v97_v11  ;;  %v99_v22 = vsub.f32 2.0, %v91_v14  ;;  %v93_v23 = vmul.f32 %v193_v15, %v77_v54 }
  0x3d   :  { %v112_v24 = vmul.f32 2.0, %v104_v16  ;;  %v106_v25 = vmul.f32 %v187_v61, %v98_v17  ;;  %v100_v26 = vsub.f32 2.0, %v92_v18  ;;  %v94_v27 = vmul.f32 %v195_v19, %v78_v55 }
  0x3e   :  { %v119_v28 = vsub.f32 1.0, %v111_v20  ;;  %v113_v29 = vmul.f32 2.0, %v105_v21  ;;  %v107_v30 = vmul.f32 %v189_v3, %v99_v22  ;;  %v101_v31 = vsub.f32 2.0, %v93_v23 }
  0x3f   :  { %v120_v32 = vsub.f32 1.0, %v112_v24  ;;  %v114_v33 = vmul.f32 2.0, %v106_v25  ;;  %v108_v34 = vmul.f32 %v191_v9, %v100_v26  ;;  %v102_v35 = vsub.f32 2.0, %v94_v27 }
  0x40   :  { %v127_v36 = vmul.f32 %v119_v28, %v273_v0  ;;  %v121_v37 = vsub.f32 1.0, %v113_v29  ;;  %v115_v38 = vmul.f32 2.0, %v107_v30  ;;  %v109_v39 = vmul.f32 %v193_v15, %v101_v31 }
  0x41   :  { %v128_v40 = vmul.f32 %v120_v32, %v275_v1  ;;  %v122_v41 = vsub.f32 1.0, %v114_v33  ;;  %v116_v42 = vmul.f32 2.0, %v108_v34  ;;  %v110_v43 = vmul.f32 %v195_v19, %v102_v35 }
  0x42   :  { %135 = vst [vmem:[#allocation5] sm:$0xff] %v127_v36  ;;  %v129_v44 = vmul.f32 %v121_v37, %v277_v2  ;;  %v123_v45 = vsub.f32 1.0, %v115_v38  ;;  %v117_v46 = vmul.f32 2.0, %v109_v39 }
  0x43   :  { %136 = vst [vmem:[#allocation5 + $0x8] sm:$0xff] %v128_v40  ;;  %v130_v47 = vmul.f32 %v122_v41, %v282_v6  ;;  %v124_v48 = vsub.f32 1.0, %v116_v42  ;;  %v118_v49 = vmul.f32 2.0, %v110_v43 }
  0x44   :  { %137 = vst [vmem:[#allocation5 + $0x10] sm:$0xff] %v129_v44  ;;  %v131_v0 = vmul.f32 %v123_v45, %v284_v7  ;;  %v125_v50 = vsub.f32 1.0, %v117_v46 }
  0x45   :  { %138 = vst [vmem:[#allocation5 + $0x18] sm:$0xff] %v130_v47  ;;  %v132_v1 = vmul.f32 %v124_v48, %v286_v8  ;;  %v126_v51 = vsub.f32 1.0, %v118_v49 }
  0x46   :  { %139 = vst [vmem:[#allocation5 + $0x20] sm:$0xff] %v131_v0  ;;  %v133_v52 = vmul.f32 %v125_v50, %v291_v12 }
  0x47   :  { %140 = vst [vmem:[#allocation5 + $0x28] sm:$0xff] %v132_v1  ;;  %v134_v2 = vmul.f32 %v126_v51, %v293_v13 }
  0x48   :  { %141 = vst [vmem:[#allocation5 + $0x30] sm:$0xff] %v133_v52 }
  0x49   :  { %142 = vst [vmem:[#allocation5 + $0x38] sm:$0xff] %v134_v2 }
  0x4a   :  { %147 = vsyncadd [#allocation4], 768  ;;  %s247_s0 = smov [#allocation5]  }
  0x4b   :  { %s148_s21 = sshll.u32 %s247_s0, 4  ;;  %s149_s21 = int_to_ptr.vmem [resolvable:$true] %s148_s21 }
  0x4c   :  { %s218_s22 = scalar_lea.vmem %s149_s21, 256  ;;  %s222_s23 = scalar_lea.vmem %s149_s21, 1024 }
  0x4d   :  { %p219_p8 = scmp.ne.s32.totalorder %s149_s21, %s218_s22  ;;  %p223_p9 = scmp.lt.s32.totalorder %s149_s21, %s149_s21 }
  0x4e   :  { %p224_p10 = scmp.lt.s32.totalorder %s222_s23, %s218_s22 }
  0x50   :  { %p225_p11 = por %p224_p10, %p223_p9 }
  0x52   :  { %p226_p12 = pnand %p225_p11, %p219_p8 }
  0x54   :  { %229 = shalt.err (!%p226_p12)
}
  0x55   :  { %s230_s26 = scalar_lea.hbm %s321_s1, 256 }
  0x56   :  { %p231_p13 = scmp.ne.s32.totalorder %s321_s1, %s230_s26  ;;  %p234_p0 = scmp.lt.u32.totalorder %s230_s26, %s321_s1 }
  0x58   :  { %p236_p1 = pnand %p234_p0, %p231_p13 }
  0x5a   :  { %239 = shalt.err (!%p236_p1)
}
  0x5b   :  { %154 = dma.vmem_to_hbm [thread:$0]  %s149_s21, 256, %s321_s1, [#allocation4], %s245_s17, %s245_s17, %s246_s18  }
  0x5c   :  { %242 = dma.done.wait [#allocation4], 1024  }
  0x5d   :  { %243 = vsyncadd [#allocation4], 4294966272 }
  0x5e   :  { %158 = vsyncpa [#allocation3], 1 }
  0x5f   :  { %159 = vsyncpa [#allocation4], 1 }

</bundles_post_ra>
